<compile_context>
chip_gen: v7x
topology: tpu7x:2x2x1
jax: 0.10.0
libtpu: 0.0.40
codegen_flags: <defaults>
</compile_context>

<pallas_src>
import jax
import jax.numpy as jnp
from jax.experimental import pallas as pl
from jax.experimental.pallas import tpu as pltpu

_TARGET_CHUNK_BYTES = 8 << 20   # ~8 MiB per DMA chunk
_MAX_CHUNKS = 16                # cap on DMAs in flight / unrolled issue loop


def _ceil_div(a, b):
    return -(-a // b)


def _resolve_shape(total, shape):
    """torch.reshape shape semantics, including a single -1 wildcard."""
    shape = tuple(int(s) for s in shape)
    if shape.count(-1) > 1:
        raise ValueError("only one dimension can be inferred")
    if -1 in shape:
        known = 1
        for s in shape:
            if s != -1:
                known *= s
        if known == 0 or total % known != 0:
            raise ValueError(f"cannot reshape {total} elements into {shape}")
        shape = tuple(total // known if s == -1 else s for s in shape)
    prod = 1
    for s in shape:
        prod *= s
    if prod != total:
        raise ValueError(f"cannot reshape {total} elements into shape {shape}")
    return shape


def _choose_lanes(total):
    """Widest lane-dense last dim (multiple of 128) dividing `total`."""
    for lanes in (4096, 2048, 1024, 512, 256, 128):
        if total % lanes == 0:
            return lanes
    return None


def _make_dma_copy_kernel(chunk_starts, chunk_rows):
    """DMA-only HBM->HBM copy: issue all chunk copies, then drain."""
    n_chunks = len(chunk_starts)

    def kernel(x_hbm, o_hbm, sem):
        # Issue phase: several DMAs in flight (one semaphore slot per chunk).
        for c in range(n_chunks):
            pltpu.make_async_copy(
                x_hbm.at[pl.ds(chunk_starts[c], chunk_rows[c])],
                o_hbm.at[pl.ds(chunk_starts[c], chunk_rows[c])],
                sem.at[c],
            ).start()
        # Drain phase.
        for c in range(n_chunks):
            pltpu.make_async_copy(
                x_hbm.at[pl.ds(chunk_starts[c], chunk_rows[c])],
                o_hbm.at[pl.ds(chunk_starts[c], chunk_rows[c])],
                sem.at[c],
            ).wait()

    return kernel


def _pallas_dma_copy_flat(flat, total):
    """Materializing identity copy of a flat buffer via HBM->HBM DMA.

    Returns the copied flat buffer, or None if the element count is not
    lane-aligned (caller falls back to the metadata-only reshape).
    """
    lanes = _choose_lanes(total)
    if lanes is None:
        # TODO(synk): handle the <128-element tail with a masked in-kernel
        # store if a materializing copy of lane-unaligned sizes is ever needed.
        return None

    rows = total // lanes
    itemsize = jnp.dtype(flat.dtype).itemsize
    row_bytes = lanes * itemsize

    # Byte-budgeted chunking (dtype-independent), capped at _MAX_CHUNKS DMAs.
    chunk_rows = max(1, _TARGET_CHUNK_BYTES // row_bytes)
    n_chunks = _ceil_div(rows, chunk_rows)
    if n_chunks > _MAX_CHUNKS:
        chunk_rows = _ceil_div(rows, _MAX_CHUNKS)
        n_chunks = _ceil_div(rows, chunk_rows)

    starts = []
    sizes = []
    r = 0
    while r < rows:
        size = min(chunk_rows, rows - r)
        starts.append(r)
        sizes.append(size)
        r += size

    kernel = _make_dma_copy_kernel(tuple(starts), tuple(sizes))
    x2d = flat.reshape(rows, lanes)

    out2d = pl.pallas_call(
        kernel,
        out_shape=jax.ShapeDtypeStruct((rows, lanes), flat.dtype),
        in_specs=[pl.BlockSpec(memory_space=pl.ANY)],
        out_specs=pl.BlockSpec(memory_space=pl.ANY),
        scratch_shapes=[pltpu.SemaphoreType.DMA((len(starts),))],
        cost_estimate=pl.CostEstimate(
            flops=0,
            transcendentals=0,
            bytes_accessed=2 * rows * lanes * itemsize,
        ),
    )(x2d)
    return out2d.reshape(-1)


def reshape_forward(x_in, *args, materialize=False):
    """Equivalent of Reshape.forward(x_in, *args).

    Default path is metadata-only (`jnp.reshape`), matching torch.reshape on a
    contiguous tensor (a view, zero HBM traffic).  `materialize=True` forces a
    fresh buffer via the DMA-only Pallas copy kernel.
    """
    if len(args) == 1 and isinstance(args[0], (tuple, list)):
        target_shape = tuple(args[0])
    else:
        target_shape = tuple(args)

    total = 1
    for s in x_in.shape:
        total *= s
    target_shape = _resolve_shape(total, target_shape)

    if total == 0 or not materialize:
        return jnp.reshape(x_in, target_shape)

    flat = jnp.reshape(x_in, (-1,))  # row-major flatten (metadata only)
    out_flat = _pallas_dma_copy_flat(flat, total)
    if out_flat is None:
        # Lane-unaligned element count: a Pallas copy buys nothing here.
        return jnp.reshape(x_in, target_shape)
    return out_flat.reshape(target_shape)


if __name__ == "__main__":
    key = jax.random.PRNGKey(0)
    # NCHW-style input, as a torch conv activation would be.
    x = jax.random.normal(key, (2, 4, 16, 16), dtype=jnp.float32)

    # Default path: metadata-only reshape (matches torch.reshape on
    # contiguous input — the highest-value "optimization" is no copy at all).
    y1 = reshape_forward(x, (2, -1))      # -> (2, 1024)
    y2 = reshape_forward(x, 2, 4, 256)    # -> (2, 4, 256)

    # Pallas DMA-copy path: explicit materializing reshape (runs the kernel).
    y3 = reshape_forward(x, (2, -1), materialize=True)

    # Same kernel on a bf16 tensor (byte-budgeted chunking is dtype-agnostic).
    xb = x.astype(jnp.bfloat16)
    y4 = reshape_forward(xb, (8, 256), materialize=True)

    # Lane-unaligned element count (3*5*7 = 105): falls back to metadata-only.
    z = jax.random.normal(jax.random.PRNGKey(0), (3, 5, 7), dtype=jnp.float32)
    y5 = reshape_forward(z, (-1, 35), materialize=True)

    jax.block_until_ready((y1, y2, y3, y4, y5))

    # Correctness checks against plain jnp.reshape (same row-major semantics
    # as torch.reshape on a contiguous tensor).
    assert y1.shape == (2, 1024)
    assert y2.shape == (2, 4, 256)
    assert y3.shape == (2, 1024)
    assert y4.shape == (8, 256)
    assert y5.shape == (3, 35)
    assert bool(jnp.array_equal(y1, x.reshape(2, -1)))
    assert bool(jnp.array_equal(y2, x.reshape(2, 4, 256)))
    assert bool(jnp.array_equal(y3, x.reshape(2, -1)))
    assert bool(jnp.array_equal(y4, xb.reshape(8, 256)))
    assert bool(jnp.array_equal(y5, z.reshape(3, 35)))

    print("KERNEL_OK")
</pallas_src>

<mosaic_0001>
module attributes {stable_mosaic.version = 11 : i64} {
  func.func @kernel(%arg0: memref<1x2048xf32, #tpu.memory_space<any>>, %arg1: memref<1x2048xf32, #tpu.memory_space<any>>, %arg2: memref<1x!tpu.dma_semaphore, #tpu.memory_space<semaphore_mem>>) attributes {dimension_semantics = [], scalar_prefetch = 0 : i64, scratch_operands = 1 : i64, tpu.core_type = #tpu.core_type<tc>} {
    %c0_i32 = arith.constant 0 : i32
    %c0_i32_0 = arith.constant 0 : i32
    %c0_i32_1 = arith.constant 0 : i32
    %0 = tpu.memref_slice %arg0[%c0_i32_0, %c0_i32_1] : memref<1x2048xf32, #tpu.memory_space<any>> -> memref<1x2048xf32, #tpu.memory_space<any>>
    %c0_i32_2 = arith.constant 0 : i32
    %c0_i32_3 = arith.constant 0 : i32
    %1 = tpu.memref_slice %arg1[%c0_i32_2, %c0_i32_3] : memref<1x2048xf32, #tpu.memory_space<any>> -> memref<1x2048xf32, #tpu.memory_space<any>>
    %2 = tpu.memref_slice %arg2[%c0_i32] : memref<1x!tpu.dma_semaphore, #tpu.memory_space<semaphore_mem>> -> memref<1x!tpu.dma_semaphore, #tpu.memory_space<semaphore_mem>>
    %3 = tpu.memref_squeeze %2 : memref<1x!tpu.dma_semaphore, #tpu.memory_space<semaphore_mem>> -> memref<!tpu.dma_semaphore, #tpu.memory_space<semaphore_mem>>
    tpu.enqueue_dma source(%0 : memref<1x2048xf32, #tpu.memory_space<any>>) target(%1 : memref<1x2048xf32, #tpu.memory_space<any>>) target_semaphore(%3 : memref<!tpu.dma_semaphore, #tpu.memory_space<semaphore_mem>>)
    %c0_i32_4 = arith.constant 0 : i32
    %c0_i32_5 = arith.constant 0 : i32
    %c0_i32_6 = arith.constant 0 : i32
    %4 = tpu.memref_slice %arg0[%c0_i32_5, %c0_i32_6] : memref<1x2048xf32, #tpu.memory_space<any>> -> memref<1x2048xf32, #tpu.memory_space<any>>
    %c0_i32_7 = arith.constant 0 : i32
    %c0_i32_8 = arith.constant 0 : i32
    %5 = tpu.memref_slice %arg1[%c0_i32_7, %c0_i32_8] : memref<1x2048xf32, #tpu.memory_space<any>> -> memref<1x2048xf32, #tpu.memory_space<any>>
    %6 = tpu.memref_slice %arg2[%c0_i32_4] : memref<1x!tpu.dma_semaphore, #tpu.memory_space<semaphore_mem>> -> memref<1x!tpu.dma_semaphore, #tpu.memory_space<semaphore_mem>>
    %7 = tpu.memref_squeeze %6 : memref<1x!tpu.dma_semaphore, #tpu.memory_space<semaphore_mem>> -> memref<!tpu.dma_semaphore, #tpu.memory_space<semaphore_mem>>
    tpu.wait_dma2 semaphore(%7 : memref<!tpu.dma_semaphore, #tpu.memory_space<semaphore_mem>>) src(%4 : memref<1x2048xf32, #tpu.memory_space<any>>) dst(%5 : memref<1x2048xf32, #tpu.memory_space<any>>)
    return
  }
}

</mosaic_0001>

<bundles_post_ra>
// kernel: tpu_custom_call.1
= control target key start
LH: loop header
LB: loop body
LE: loop exit
PB: predicated region body
PF: predicated region fallthrough
CT: control target
= control target key end

     0   :  { %s34_s6 = smov [#allocation2]   ;;  %s35_s7 = smov [#allocation3]   ;;  %s53_s0 = inlined_call_operand.hbm [shape: f32[1,2048], index: 0, kind: input, shape index: {}]   ;;  %s54_s1 = inlined_call_operand.hbm [shape: f32[1,2048], index: 1, kind: output, shape index: {}]  }
   0x1   :  { %s36_s8 = smov 0  }
   0x2   :  { %18 = dma.general %s53_s0, 256, %s54_s1, %s34_s6, %s35_s7, [#allocation4], %s36_s8, 0  }
   0x3   :  { %32 = dma.done.wait [#allocation2], 256 }
   0x4   :  { %33 = vsyncadd [#allocation2], 4294967040 }
   0x5   :  { %22 = vsyncmov [#allocation2] }
   0x8   :  { %s23_s13 = vpop.sfrf %22 }
   0x9   :  { %p28_p0 = scmp.ne.s32.totalorder %s23_s13, 0 }
   0xb   :  { %27 = shalt.err (%p28_p0)  }

</bundles_post_ra>
